<compile_context>
chip_gen: v6e
topology: v6e:2x2x1
jax: 0.10.0
libtpu: 0.0.40
codegen_flags: <defaults>
</compile_context>

<pallas_src>
import functools

import jax
import jax.numpy as jnp
from jax.experimental import pallas as pl
from jax.experimental.pallas import tpu as pltpu


def _rel_pos_emb_kernel(pos_ref, invf_ref, o_ref, *, half):
    # pos_ref:  (tm, 1)    f32 positions for this row tile
    # invf_ref: (1, half)  f32 inverse frequencies (resident, tiny)
    # o_ref:    (tm, d)    f32 output tile (d on lanes)
    s = pos_ref[...] * invf_ref[...]          # (tm, half) via VPU broadcast mul
    # Store the two halves directly (no concatenate -> no extra VMEM round-trip).
    o_ref[:, :half] = jnp.sin(s)
    o_ref[:, half:] = jnp.cos(s)


def _round_up(x, m):
    return ((x + m - 1) // m) * m


def _pick_tile_rows(L, d, *, target_tile_bytes=2 << 20):
    """Byte-budgeted row tile (multiple of 8), with >= 2 grid steps when possible."""
    # ~2 MiB f32 output tile amortizes the ~0.35us per-grid-step overhead; the
    # double-buffered output (2 * tm * d * 4 <= 4 MiB) plus tiny inputs fits
    # every generation's scoped-VMEM default (v5e 16 MiB, v6e/v7x 32 MiB / TC).
    tm = max(8, (target_tile_bytes // (d * 4)) // 8 * 8)
    # Guarantee >= 2 grid steps for small/medium L so the "parallel" axis can
    # shard across both TensorCores on v7x (neutral on single-TC v5e/v6e).
    half_rows = max(8, _round_up(-(-L // 2), 8))
    return min(tm, half_rows)


def relative_positional_embedding(positions, d):
    """positions: (L,) int/float -> (L, 1, d) float32, matching the torch module."""
    assert d % 2 == 0, "d must be even (sin/cos halves)"
    L = positions.shape[0]
    half = d // 2

    # Buffer computed at "init" time, exactly as in the torch module.
    inv_freq = (1.0 / (10000.0 ** (jnp.arange(0.0, d, 2.0, dtype=jnp.float32) / d))
                ).reshape(1, half)
    pos_f = positions.astype(jnp.float32).reshape(L, 1)

    tm = _pick_tile_rows(L, d)
    grid = (pl.cdiv(L, tm),)   # ragged last block is masked by Pallas (no pad/slice copy)

    out = pl.pallas_call(
        functools.partial(_rel_pos_emb_kernel, half=half),
        out_shape=jax.ShapeDtypeStruct((L, d), jnp.float32),
        grid_spec=pltpu.PrefetchScalarGridSpec(
            num_scalar_prefetch=0,
            grid=grid,
            in_specs=[
                pl.BlockSpec((tm, 1), lambda i: (i, 0)),    # positions row tile
                pl.BlockSpec((1, half), lambda i: (0, 0)),  # inv_freq (resident)
            ],
            out_specs=pl.BlockSpec((tm, d), lambda i: (i, 0)),
        ),
        compiler_params=pltpu.CompilerParams(
            dimension_semantics=("parallel",),  # independent row tiles -> megacore
        ),
    )(pos_f, inv_freq)

    # pos_emb[:, None, :] — pure reshape, kept outside the kernel (a size-1
    # second-to-last dim inside the kernel would pad sublanes 8x).
    return out[:, None, :]


def _reference(positions, d):
    inv_freq = 1.0 / (10000.0 ** (jnp.arange(0.0, d, 2.0, dtype=jnp.float32) / d))
    sinusoid = jnp.einsum("i,j->ij", positions.astype(jnp.float32), inv_freq)
    pos_emb = jnp.concatenate([jnp.sin(sinusoid), jnp.cos(sinusoid)], axis=-1)
    return pos_emb[:, None, :]


if __name__ == "__main__":
    key = jax.random.PRNGKey(0)

    # Small, module-consistent test: relative positions for a short sequence.
    S, d = 16, 32
    positions = jax.random.randint(key, (S,), -8, 8).astype(jnp.int32)

    out = relative_positional_embedding(positions, d)
    out = jax.block_until_ready(out)
    ref = _reference(positions, d)
    assert out.shape == (S, 1, d)
    assert jnp.allclose(out, ref, atol=1e-5, rtol=1e-5), "mismatch vs reference (small)"

    # Second case: ragged last block (L not a tile multiple) + lane-dense d,
    # typical Transformer-XL usage (descending relative positions).
    S2, d2 = 300, 256
    positions2 = jnp.arange(S2 - 1, -1, -1, dtype=jnp.int32)
    out2 = relative_positional_embedding(positions2, d2)
    out2 = jax.block_until_ready(out2)
    ref2 = _reference(positions2, d2)
    assert out2.shape == (S2, 1, d2)
    assert jnp.allclose(out2, ref2, atol=1e-5, rtol=1e-5), "mismatch vs reference (large)"

    print("KERNEL_OK")
</pallas_src>

<mosaic_0001>
module attributes {stable_mosaic.version = 11 : i64} {
  func.func @_rel_pos_emb_kernel(%arg0: i32, %arg1: memref<8x1xf32, #tpu.memory_space<vmem>>, %arg2: memref<1x16xf32, #tpu.memory_space<vmem>>, %arg3: memref<8x32xf32, #tpu.memory_space<vmem>>) attributes {dimension_semantics = [#tpu.dimension_semantics<parallel>], iteration_bounds = array<i64: 2>, scalar_prefetch = 0 : i64, scratch_operands = 0 : i64, tpu.core_type = #tpu.core_type<tc>, window_params = [{transform_indices = @transform_0, window_bounds = array<i64: 8, 1>}, {pipeline_mode = #tpu.pipeline_mode<synchronous>, transform_indices = @transform_1, window_bounds = array<i64: 1, 16>}, {transform_indices = @transform_2, window_bounds = array<i64: 8, 32>}]} {
    %c0 = arith.constant 0 : index
    %c0_0 = arith.constant 0 : index
    %0 = vector.load %arg1[%c0, %c0_0] : memref<8x1xf32, #tpu.memory_space<vmem>>, vector<8x1xf32>
    %c0_1 = arith.constant 0 : index
    %c0_2 = arith.constant 0 : index
    %1 = vector.load %arg2[%c0_1, %c0_2] : memref<1x16xf32, #tpu.memory_space<vmem>>, vector<1x16xf32>
    %2 = vector.broadcast %0 : vector<8x1xf32> to vector<8x16xf32>
    %3 = vector.broadcast %1 : vector<1x16xf32> to vector<8x16xf32>
    %4 = arith.mulf %2, %3 : vector<8x16xf32>
    %5 = math.sin %4 : vector<8x16xf32>
    %c0_3 = arith.constant 0 : index
    %c0_4 = arith.constant 0 : index
    %6 = vector.load %arg3[%c0_3, %c0_4] : memref<8x32xf32, #tpu.memory_space<vmem>>, vector<8x16xf32>
    tpu.vector_store %arg3[%c0_3, %c0_4], %5 {strides = array<i32>} : memref<8x32xf32, #tpu.memory_space<vmem>>, vector<8x16xf32>,
    %7 = math.cos %4 : vector<8x16xf32>
    %c0_5 = arith.constant 0 : index
    %c16 = arith.constant 16 : index
    %8 = vector.load %arg3[%c0_5, %c16] : memref<8x32xf32, #tpu.memory_space<vmem>>, vector<8x16xf32>
    tpu.vector_store %arg3[%c0_5, %c16], %7 {strides = array<i32>} : memref<8x32xf32, #tpu.memory_space<vmem>>, vector<8x16xf32>,
    return
  }
  func.func @transform_0(%arg0: i32) -> (i32, i32) {
    %c0_i32 = arith.constant 0 : i32
    %c0_i32_0 = arith.constant 0 : i32
    return %arg0, %c0_i32 : i32, i32
  }
  func.func @transform_1(%arg0: i32) -> (i32, i32) {
    %c0_i32 = arith.constant 0 : i32
    %c0_i32_0 = arith.constant 0 : i32
    %c0_i32_1 = arith.constant 0 : i32
    return %c0_i32, %c0_i32_0 : i32, i32
  }
  func.func @transform_2(%arg0: i32) -> (i32, i32) {
    %c0_i32 = arith.constant 0 : i32
    %c0_i32_0 = arith.constant 0 : i32
    return %arg0, %c0_i32 : i32, i32
  }
}

</mosaic_0001>

<bundles_post_ra>
// kernel: tpu_custom_call.1
= control target key start
LH: loop header
LB: loop body
LE: loop exit
PB: predicated region body
PF: predicated region fallthrough
CT: control target
= control target key end

     0   :  { %7 = vsyncpa [#allocation3], 0  ;;  %s724_s0 = inlined_call_operand.vmem [shape: f32[16,1], index: 0, kind: input, shape index: {}]   ;;  %s725_s1 = inlined_call_operand.vmem [shape: f32[1,16], index: 1, kind: input, shape index: {}]   ;;  %s726_s2 = inlined_call_operand.hbm [shape: f32[16,32], index: 2, kind: output, shape index: {}]  }
   0x1   :  { %9 = vsyncpa [#allocation3 + $0x1], 0  ;;  %s602_s9 = smov 0   ;;  %s604_s10 = smov 0  }
   0x2   :  { %s606_s11 = smov 0   ;;  %s608_s12 = smov 0  }
   0x3 LB: > { %s623_s13 = sadd.s32 4294967295, %s576_s12   ;;  %s441_s14 = sadd.s32 4294967294, %s576_s12   ;;  %s576_s12 = sphi %s608_s12, %s732_s12   ;;  %s572_s11 = sphi %s606_s11, %s731_s11   ;;  %s568_s10 = sphi %s604_s10, %s730_s10   ;;  %s564_s9 = sphi %s602_s9, %s729_s9  }
   0x4   : > { %s627_s15 = sadd.s32 1, %s576_s12   ;;  %s69_s16 = sadd.s32 1, %s572_s11 }
   0x5   : > { %s66_s17 = ssub.s32 %s576_s12, %s627_s15  ;;  %p79_p0 = scmp.ne.s32.totalorder %s572_s11, %s568_s10 }
   0x6   : > { %p67_p1 = scmp.eq.s32.totalorder %s66_s17, 0  ;;  %p80_p2 = scmp.eq.s32.totalorder %s623_s13, 1 }
   0x7   : > { %p85_p3 = scmp.ne.s32.totalorder %s568_s10, %s564_s9  ;;  %p86_p4 = scmp.eq.s32.totalorder %s441_s14, 1 }
   0x8   : > { %s638_s18 = scalar_select %p67_p1, %s572_s11, %s69_s16  }
   0x9   : > { %p640_p5 = por %p80_p2, %p79_p0  ;;  %p644_p6 = por %p86_p4, %p85_p3 }
   0xa   : > { %p444_p7 = scmp.ge.s32.totalorder %s576_s12, 1  ;;  %p114_p8 = scmp.lt.s32.totalorder %s576_s12, 3 }
   0xc   : > { %p115_p9 = pnand %p444_p7, %p114_p8 }
   0xd   : > { %p135_p10 = scmp.lt.s32.totalorder (!%p115_p9), %s623_s13, 1  ;;  %s132_s28 = sand.u32 (!%p115_p9), 1, %s568_s10  }
   0xe   : > { %118 = sbr.rel (%p115_p9) target bundleno = 360 (0x168), region = 28  ;;  %s445_s29 = sshll.u32 (!%p115_p9), %s132_s28, 3 }
   0xf   : > { %s585_s30 = smov (!%p115_p9), 16   ;;  %s134_s3 = scalar_lea.vmem (!%p115_p9), [#allocation2], %s445_s29 }
  0x10   : > { %s457_s4 = sshll.u32 (!%p115_p9), %s623_s13, 7  ;;  %s382_s5 = sshll.u32 (!%p115_p9), %s134_s3, 4  ;;  %s383_s5 = int_to_ptr.vmem [resolvable:$true] %s382_s5 }
  0x11   : > { %s687_s8 = scalar_lea.hbm (!%p115_p9), %s726_s2, %s457_s4  ;;  %s369_s14 = scalar_lea.sflag (!%p115_p9), [#allocation3], %s132_s28 }
  0x12   : > { %s516_s16 = scalar_lea.vmem (!%p115_p9), %s383_s5, 128  ;;  %s586_s17 = smov (!%p115_p9), [#allocation2]  }
  0x13   : > { %v578_v0 = vmov 0   ;;  %s136_s21 = scalar_select %p135_p10, %s623_s13, 1  ;;  %v447_v2 = vld [vmem:[%s725_s1] ss:$0 sm:$0xff]  ;;  %v579_v15 = vmov 683565275  }
  0x14   : > { %511 = vset.pattern.permute.xlu0 %v578_v0  ;;  %v580_v17 = vmov 2475754826   ;;  %v581_v20 = vmov 2131351028   ;;  %v582_v23 = vmov 2102212464   ;;  %p517_p11 = scmp.ne.s32.totalorder %s383_s5, %s516_s16 }
  0x15   : > { %s446_s22 = sshll.u32 %s136_s21, 3  ;;  %v583_v26 = vmov 920167782   ;;  %v584_v29 = vmov 1326507024   ;;  %vm257_vm11 = vcmask 130048  }
  0x16   : > { %s138_s25 = scalar_lea.vmem %s724_s0, %s446_s22  ;;  %p518_p12 = pnand %p517_p11, %p640_p5 }
  0x17   : > { %v139_v1 = vld [vmem:[%s138_s25] sm:$0xff]  ;;  %s520_s21 = sshll.u32 %s586_s17, 4  ;;  %s521_s21 = int_to_ptr.vmem [resolvable:$false] %s520_s21 }
  0x18   : > { %143 = vperm.xlu0 %511, %v139_v1   ;;  %p519_p13 = pneg %p518_p12  ;;  %s522_s13 = scalar_lea.vmem %s521_s21, 256 }
  0x19   : > { %p523_p0 = scmp.lt.s32.totalorder %s383_s5, %s521_s21  ;;  %p524_p1 = scmp.lt.s32.totalorder %s522_s13, %s516_s16 }
  0x1b   : > { %p525_p2 = por %p524_p1, %p523_p0 }
  0x1d   : > { %p526_p3 = pnand %p525_p2, %p519_p13 }
  0x93   : > { %v144_v3 = vpop.permute.xlu0 %143 }
  0x94   : > { %v658_v4 = vmul.f32 %v447_v2, %v144_v3 }
  0x96   : > { %v156_v5 = vand.u32 2139095040, %v658_v4  ;;  %v153_v9 = vand.u32 2147483647, %v658_v4  ;;  %vm155_vm7 = vcmp.lt.s32.totalorder %v658_v4, 0 }
  0x98   : > { %v157_v6 = vshrl.u32 %v156_v5, 23  ;;  %v160_v12 = vand.u32 8388607, %v153_v9  ;;  %vm154_vm8 = vcmp.le.f32.partialorder %v153_v9, 0.7853982 }
  0x9a   : > { %v448_v7 = vadd.s32 4294967169, %v157_v6  ;;  %v161_v31 = vor.u32 8388608, %v160_v12 }
  0x9c   : > { %v163_v8 = vadd.s32 1, %v448_v7  ;;  %v201_v45 = vshll.u32 %v161_v31, 8 }
  0x9e   : > { %vm164_vm0 = vcmp.gt.s32.totalorder %v163_v8, 0 }
  0x9f   : > { %v165_v10 = vsel %vm164_vm0, %v163_v8, 0  ;;  %vm245_vm0 = vweird.f32 %v658_v4 }
  0xa0   : > { %v167_v11 = vand.u32 31, %v165_v10  ;;  %v166_v14 = vshrl.u32 %v165_v10, 5 }
  0xa2   : > { %v168_v13 = vsub.s32 32, %v167_v11  ;;  %v170_v16 = vshll.u32 %v579_v15, %v167_v11  ;;  %v173_v18 = vshll.u32 %v580_v17, %v167_v11  ;;  %v176_v22 = vshll.u32 %v581_v20, %v167_v11 }
  0xa3   : > { %v179_v25 = vshll.u32 %v582_v23, %v167_v11  ;;  %v182_v28 = vshll.u32 %v583_v26, %v167_v11  ;;  %vm185_vm1 = vcmp.lt.s32.totalorder %v166_v14, 1  ;;  %vm188_vm2 = vcmp.lt.s32.totalorder %v166_v14, 4 }
  0xa4   : > { %v171_v19 = vshrl.u32 %v580_v17, %v168_v13  ;;  %v174_v21 = vshrl.u32 %v581_v20, %v168_v13  ;;  %v177_v24 = vshrl.u32 %v582_v23, %v168_v13  ;;  %v180_v27 = vshrl.u32 %v583_v26, %v168_v13 }
  0xa5   : > { %v183_v30 = vshrl.u32 %v584_v29, %v168_v13  ;;  %v169_v40 = vshrl.u32 %v579_v15, %v168_v13  ;;  %vm187_vm3 = vcmp.lt.s32.totalorder %v166_v14, 3  ;;  %vm186_vm4 = vcmp.lt.s32.totalorder %v166_v14, 2 }
  0xa6   : > { %v172_v32 = vor.u32 %v171_v19, %v170_v16  ;;  %v175_v33 = vor.u32 %v174_v21, %v173_v18  ;;  %v178_v34 = vor.u32 %v177_v24, %v176_v22  ;;  %v181_v35 = vor.u32 %v180_v27, %v179_v25 }
  0xa7   : > { %v184_v36 = vor.u32 %v183_v30, %v182_v28 }
  0xa8   : > { %v190_v37 = vsel %vm188_vm2, %v178_v34, 2102212464  ;;  %v193_v38 = vsel %vm185_vm1, %v172_v32, %v175_v33  ;;  %v197_v39 = vsel %vm185_vm1, %v175_v33, %v178_v34  ;;  %v194_v41 = vsel %vm188_vm2, %v181_v35, 920167782 }
  0xa9   : > { %v198_v42 = vsel %vm188_vm2, %v184_v36, 1326507024  ;;  %v195_v43 = vsel %vm187_vm3, %v178_v34, %v194_v41  ;;  %v189_v46 = vsel %vm185_vm1, %v169_v40, %v172_v32  ;;  %v191_v47 = vsel %vm187_vm3, %v175_v33, %v190_v37 }
  0xaa   : > { %v199_v44 = vsel %vm187_vm3, %v181_v35, %v198_v42  ;;  %v196_v48 = vsel %vm186_vm4, %v193_v38, %v195_v43  ;;  %v192_v54 = vsel %vm186_vm4, %v189_v46, %v191_v47  ;;  %vm366_vm1 = vcmask 261248  }
  0xab   : > { %v200_v49 = vsel %vm186_vm4, %v197_v39, %v199_v44  ;;  %v667_v52 = vmul.u32.u64.low %v201_v45, %v196_v48  ;;  %v668_v53 = vmul.u32.u64.high %v201_v45, %v196_v48, %v667_v52  ;;  %v208_v56 = vmul.u32 %v201_v45, %v192_v54 }
  0xac   : > { %v664_v50 = vmul.u32.u64.low %v201_v45, %v200_v49  ;;  %v665_v51 = vmul.u32.u64.high %v201_v45, %v200_v49, %v664_v50 }
  0xad   : > { %v211_v55 = vadd.s32 1, %v668_v53 }
  0xae   : > { %vm210_vm5 = vc.u32 %v665_v51, %v667_v52  ;;  %v209_v5 = vadd.s32 %v667_v52, %v665_v51 }
  0xaf   : > { %v212_v57 = vsel %vm210_vm5, %v211_v55, %v668_v53 }
  0xb0   : > { %v213_v58 = vadd.s32 %v212_v57, %v208_v56 }
  0xb2   : > { %v214_v59 = vadd.s32 536870912, %v213_v58 }
  0xb4   : > { %v215_v60 = vshrl.u32 %v214_v59, 30 }
  0xb6   : > { %v216_v61 = vshll.u32 %v215_v60, 30  ;;  %v239_v19 = vsub.s32 4, %v215_v60 }
  0xb8   : > { %v217_v62 = vsub.s32 %v213_v58, %v216_v61  ;;  %v240_v22 = vsel %vm155_vm7, %v239_v19, %v215_v60 }
  0xb9   : > { %v242_v23 = vsel %vm154_vm8, 0, %v240_v22 }
  0xba   : > { %v219_v63 = vsub.s32 0, %v217_v62  ;;  %v246_v24 = vadd.s32 3, %v242_v23  ;;  %v352_v26 = vand.u32 3, %v242_v23 }
  0xbc   : > { %v449_v0 = vmin.u32 %v219_v63, %v217_v62  ;;  %v247_v25 = vand.u32 3, %v246_v24  ;;  %vm357_vm10 = vcmp.eq.s32.totalorder %v352_v26, 2  ;;  %vm354_vm13 = vcmp.eq.s32.totalorder %v352_v26, 0 }
  0xbd   : > { %vm353_vm15 = vcmp.lt.s32.totalorder %v352_v26, 2 }
  0xbe   : > { %v221_v1 = vclz %v449_v0  ;;  %vm252_vm9 = vcmp.eq.s32.totalorder %v247_v25, 2  ;;  %vm249_vm12 = vcmp.eq.s32.totalorder %v247_v25, 0  ;;  %vm248_vm14 = vcmp.lt.s32.totalorder %v247_v25, 2 }
  0xc0   : > { %v450_v2 = vadd.s32 4294967294, %v221_v1 }
  0xc2   : > { %vm451_vm6 = vcmp.lt.s32.totalorder %v450_v2, 0 }
  0xc3   : > { %v224_v3 = vsel %vm451_vm6, 0, %v450_v2 }
  0xc4   : > { %v225_v6 = vsub.s32 32, %v224_v3  ;;  %v229_v7 = vsub.s32 4294967266, %v224_v3  ;;  %v226_v8 = vshll.u32 %v217_v62, %v224_v3 }
  0xc6   : > { %v227_v10 = vshrl.u32 %v209_v5, %v225_v6  ;;  %v230_v11 = vadd.s32 127, %v229_v7 }
  0xc8   : > { %v228_v12 = vor.u32 %v227_v10, %v226_v8  ;;  %v231_v13 = vshll.u32 %v230_v11, 23 }
  0xca   : > { %v232_v14 = vor.u32 4788187, %v231_v13  ;;  %v235_v16 = vcvt.s32.f32 %v228_v12 }
  0xcc   : > { %v233_v15 = vand.u32 2147483647, %v232_v14 }
  0xce   : > { %v236_v17 = vmul.f32 %v235_v16, %v233_v15 }
  0xd0   : > { %v237_v18 = vxor.u32 2147483648, %v236_v17 }
  0xd2   : > { %v238_v20 = vsel %vm155_vm7, %v237_v18, %v236_v17 }
  0xd3   : > { %v241_v21 = vsel %vm154_vm8, %v658_v4, %v238_v20 }
  0xd4   : > { %512 = vcosq.f32 %v241_v21 }
  0xd5   : > { %514 = vsinq.f32 %v241_v21 }
  0xe1   : > { %v513_v27 = vpop.eup %512 }
  0xe2   : > { %v515_v28 = vpop.eup %514  ;;  %v253_v29 = vxor.u32 2147483648, %v513_v27 }
  0xe3   : > { %v250_v30 = vxor.u32 2147483648, %v515_v28 }
  0xe4   : > { %v359_v9 = vsel %vm357_vm10, %v253_v29, %v515_v28  ;;  %v254_v31 = vsel %vm252_vm9, %v253_v29, %v515_v28 }
  0xe5   : > { %v356_v32 = vsel %vm354_vm13, %v513_v27, %v250_v30  ;;  %v251_v33 = vsel %vm249_vm12, %v513_v27, %v250_v30 }
  0xe6   : > { %v360_v34 = vsel %vm353_vm15, %v356_v32, %v359_v9  ;;  %v255_v35 = vsel %vm248_vm14, %v251_v33, %v254_v31 }
  0xe7   : > { %v361_v36 = vsel %vm245_vm0, nan, %v360_v34  ;;  %v256_v37 = vsel %vm245_vm0, nan, %v255_v35 }
  0xe8   : > { %363 = vrot.lane.b32.xlu0 %v361_v36, %s585_s30  ;;  %258 = vst.msk [vmem:[%s134_s3] sm:$0xff] %vm257_vm11, %v256_v37 }
 0x15a   : > { %v364_v4 = vpop.permute.xlu0 %363 }
 0x15b   : > { %367 = vst.msk [vmem:[%s134_s3] sm:$0xff] %vm366_vm1, %v364_v4 }
 0x15c   : > { %529 = shalt.err (!%p526_p3)
}
 0x15d   : > { %s530_s22 = scalar_lea.hbm %s687_s8, 128  ;;  %s534_s25 = scalar_lea.hbm %s726_s2, 256 }
 0x15e   : > { %p531_p4 = scmp.ne.s32.totalorder %s687_s8, %s530_s22  ;;  %p535_p9 = scmp.lt.s32.totalorder %s687_s8, %s726_s2 }
 0x15f   : > { %p536_p10 = scmp.lt.s32.totalorder %s534_s25, %s530_s22 }
 0x160   : > { %p532_p7 = pnand %p531_p4, %p640_p5 }
 0x161   : > { %p537_p11 = por %p536_p10, %p535_p9 }
 0x162   : > { %p533_p8 = pneg %p532_p7 }
 0x164   : > { %p538_p12 = pnand %p537_p11, %p533_p8 }
 0x166   : > { %541 = shalt.err (!%p538_p12)
}
 0x167   : > { %464 = dma.vmem_to_hbm [thread:$0]  (%p640_p5), %s383_s5, 128, %s687_s8, %s369_s14  }
 0x168 PF: > { %p470_p13 = scmp.ge.s32.totalorder %s576_s12, 2  ;;  %s394_s28 = sand.u32 1, %s564_s9  }
 0x169   : > { %s395_s29 = scalar_lea.sflag [#allocation3], %s394_s28 }
 0x16a   : > { %p467_p0 = pnand %p470_p13, %p644_p6 }
 0x16c   : > { %p468_p1 = pneg %p467_p0 }
 0x16e   : > { %559 = dma.done.wait (%p468_p1), %s395_s29, 128  }
 0x16f   : > { %561 = vsyncadd (%p468_p1), %s395_s29, 4294967168  ;;  %p12_p2 = scmp.ge.s32.totalorder %s627_s15, 4   ;;  %s729_s9 = smov %s568_s10 }
 0x170   : > { %s730_s10 = smov %s572_s11  ;;  %s731_s11 = smov %s638_s18 }
 0x171   : > { %s732_s12 = smov %s627_s15  ;;  %14 = sbr.rel (!%p12_p2) target bundleno = 3 (0x3), region = 63 }
 0x176   :  { %400 = vsyncpa [#allocation3], 1 }
 0x177   :  { %402 = vsyncpa [#allocation3 + $0x1], 1 }

</bundles_post_ra>
